<compile_context>
chip_gen: v7x
topology: tpu7x:2x2x1
jax: 0.10.0
libtpu: 0.0.40
codegen_flags: <defaults>
</compile_context>

<pallas_src>
import jax
import jax.numpy as jnp
from jax.experimental import pallas as pl
from jax.experimental.pallas import tpu as pltpu


def _policy_ce_kernel(p_logits_ref, p_target_ref, policy_out_ref):
    # (TB, N) tile of logits / soft targets; upcast to f32 for stable reductions.
    logits = p_logits_ref[...].astype(jnp.float32)
    tgt = p_target_ref[...].astype(jnp.float32)

    # log-sum-exp per row (max-shifted).
    m = jnp.max(logits, axis=-1, keepdims=True)                       # (TB, 1)
    sumexp = jnp.sum(jnp.exp(logits - m), axis=-1, keepdims=True)     # (TB, 1)
    lse = m + jnp.log(sumexp)                                         # (TB, 1)

    # -sum_c t * log_softmax(logits) == sum(t) * lse - sum(t * logits)
    s_t = jnp.sum(tgt, axis=-1, keepdims=True)                        # (TB, 1)
    s_tl = jnp.sum(tgt * logits, axis=-1, keepdims=True)              # (TB, 1)

    policy_out_ref[...] = s_t * lse - s_tl


def _pick_batch_tile(batch, n, itemsize):
    """Pick a batch tile: multiple of 8 (f32 sublane), ~2 MiB/input/buffer."""
    budget_bytes = 2 * 1024 * 1024
    tb = budget_bytes // max(1, n * itemsize)
    tb = min(tb, batch)
    if tb >= batch:
        return batch                      # single full block (any B)
    tb = max(8, (tb // 8) * 8)            # keep (8, 128) sublane alignment
    return min(tb, batch)


def policy_value_loss(y_pred, y):
    """y_pred = (policy_logits NCHW, value), y = (policy_probs NCHW, value).

    Returns (policy_loss (B,), value_loss same shape as y_pred[1]) — matching the
    PyTorch module's forward with reduction='none'.
    """
    p_logits, v_pred = y_pred
    p_target, v_target = y

    batch = p_logits.shape[0]
    # glue: flatten policy (B, C, H, W) -> lane-dense (B, N)
    p_logits2d = p_logits.reshape(batch, -1)
    p_target2d = p_target.reshape(batch, -1)
    n = p_logits2d.shape[1]

    itemsize = max(jnp.dtype(p_logits2d.dtype).itemsize,
                   jnp.dtype(p_target2d.dtype).itemsize)
    tb = _pick_batch_tile(batch, n, itemsize)
    grid = (pl.cdiv(batch, tb),)

    policy_out = pl.pallas_call(
        _policy_ce_kernel,
        out_shape=jax.ShapeDtypeStruct((batch, 1), jnp.float32),
        grid_spec=pltpu.PrefetchScalarGridSpec(
            num_scalar_prefetch=0,
            grid=grid,
            in_specs=[
                pl.BlockSpec((tb, n), lambda i: (i, 0)),
                pl.BlockSpec((tb, n), lambda i: (i, 0)),
            ],
            out_specs=pl.BlockSpec((tb, 1), lambda i: (i, 0)),
        ),
        compiler_params=pltpu.CompilerParams(
            dimension_semantics=("parallel",),
        ),
    )(p_logits2d, p_target2d)

    # Value MSE (reduction='none'): tiny elementwise op, done in plain JAX so the
    # kernel keeps a clean two-input pipeline and no 1-lane masked stores.
    diff = v_pred - v_target
    value_loss = diff * diff

    return policy_out.reshape(batch), value_loss


if __name__ == "__main__":
    key = jax.random.PRNGKey(0)
    k1, k2, k3, k4 = jax.random.split(key, 4)

    B, C, H, W = 2, 4, 8, 8

    # predicted policy logits (NCHW) and soft-target policy distribution
    policy_logits = jax.random.normal(k1, (B, C, H, W), dtype=jnp.float32)
    target_logits = jax.random.normal(k2, (B, C, H, W), dtype=jnp.float32)
    policy_target = jax.nn.softmax(
        target_logits.reshape(B, -1), axis=-1).reshape(B, C, H, W)

    # value head outputs / targets
    value_pred = jax.random.normal(k3, (B, 1), dtype=jnp.float32)
    value_target = jax.random.normal(k4, (B, 1), dtype=jnp.float32)

    policy_loss, value_loss = policy_value_loss(
        (policy_logits, value_pred), (policy_target, value_target)
    )
    jax.block_until_ready((policy_loss, value_loss))

    # reference check (plain JAX) to make sure semantics match PyTorch
    lp = jax.nn.log_softmax(policy_logits.reshape(B, -1), axis=-1)
    ref_policy = -jnp.sum(policy_target.reshape(B, -1) * lp, axis=-1)
    ref_value = (value_pred - value_target) ** 2
    assert policy_loss.shape == (B,)
    assert value_loss.shape == value_pred.shape
    assert jnp.allclose(policy_loss, ref_policy, atol=1e-5, rtol=1e-5)
    assert jnp.allclose(value_loss, ref_value, atol=1e-5, rtol=1e-5)

    print("KERNEL_OK")
</pallas_src>

<mosaic_0001>
module attributes {stable_mosaic.version = 11 : i64} {
  func.func @_policy_ce_kernel(%arg0: i32, %arg1: memref<2x256xf32, #tpu.memory_space<vmem>>, %arg2: memref<2x256xf32, #tpu.memory_space<vmem>>, %arg3: memref<2x1xf32, #tpu.memory_space<vmem>>) attributes {dimension_semantics = [#tpu.dimension_semantics<parallel>], iteration_bounds = array<i64: 1>, scalar_prefetch = 0 : i64, scratch_operands = 0 : i64, tpu.core_type = #tpu.core_type<tc>, window_params = [{transform_indices = @transform_0, window_bounds = array<i64: 2, 256>}, {transform_indices = @transform_1, window_bounds = array<i64: 2, 256>}, {transform_indices = @transform_2, window_bounds = array<i64: 2, 1>}]} {
    %c0 = arith.constant 0 : index
    %c0_0 = arith.constant 0 : index
    %0 = vector.load %arg1[%c0, %c0_0] : memref<2x256xf32, #tpu.memory_space<vmem>>, vector<2x256xf32>
    %c0_1 = arith.constant 0 : index
    %c0_2 = arith.constant 0 : index
    %1 = vector.load %arg2[%c0_1, %c0_2] : memref<2x256xf32, #tpu.memory_space<vmem>>, vector<2x256xf32>
    %cst = arith.constant dense<0xFF800000> : vector<2xf32>
    %2 = vector.multi_reduction <maximumf>, %0, %cst [1] : vector<2x256xf32> to vector<2xf32>
    %3 = vector.shape_cast %2 : vector<2xf32> to vector<2x1xf32>
    %4 = vector.broadcast %3 : vector<2x1xf32> to vector<2x256xf32>
    %5 = arith.subf %0, %4 : vector<2x256xf32>
    %6 = math.exp %5 : vector<2x256xf32>
    %cst_3 = arith.constant dense<0.000000e+00> : vector<2xf32>
    %7 = vector.multi_reduction <add>, %6, %cst_3 [1] : vector<2x256xf32> to vector<2xf32>
    %8 = vector.shape_cast %7 : vector<2xf32> to vector<2x1xf32>
    %9 = math.log %8 : vector<2x1xf32>
    %10 = arith.addf %3, %9 : vector<2x1xf32>
    %cst_4 = arith.constant dense<0.000000e+00> : vector<2xf32>
    %11 = vector.multi_reduction <add>, %1, %cst_4 [1] : vector<2x256xf32> to vector<2xf32>
    %12 = vector.shape_cast %11 : vector<2xf32> to vector<2x1xf32>
    %13 = arith.mulf %1, %0 : vector<2x256xf32>
    %cst_5 = arith.constant dense<0.000000e+00> : vector<2xf32>
    %14 = vector.multi_reduction <add>, %13, %cst_5 [1] : vector<2x256xf32> to vector<2xf32>
    %15 = vector.shape_cast %14 : vector<2xf32> to vector<2x1xf32>
    %16 = arith.mulf %12, %10 : vector<2x1xf32>
    %17 = arith.subf %16, %15 : vector<2x1xf32>
    %c0_6 = arith.constant 0 : index
    %c0_7 = arith.constant 0 : index
    %18 = vector.load %arg3[%c0_6, %c0_7] : memref<2x1xf32, #tpu.memory_space<vmem>>, vector<2x1xf32>
    tpu.vector_store %arg3[%c0_6, %c0_7], %17 {strides = array<i32>} : memref<2x1xf32, #tpu.memory_space<vmem>>, vector<2x1xf32>,
    return
  }
  func.func @transform_0(%arg0: i32) -> (i32, i32) {
    %c0_i32 = arith.constant 0 : i32
    %c0_i32_0 = arith.constant 0 : i32
    return %arg0, %c0_i32 : i32, i32
  }
  func.func @transform_1(%arg0: i32) -> (i32, i32) {
    %c0_i32 = arith.constant 0 : i32
    %c0_i32_0 = arith.constant 0 : i32
    return %arg0, %c0_i32 : i32, i32
  }
  func.func @transform_2(%arg0: i32) -> (i32, i32) {
    %c0_i32 = arith.constant 0 : i32
    %c0_i32_0 = arith.constant 0 : i32
    return %arg0, %c0_i32 : i32, i32
  }
}

</mosaic_0001>

<bundles_post_ra>
// kernel: tpu_custom_call.1
= control target key start
LH: loop header
LB: loop body
LE: loop exit
PB: predicated region body
PF: predicated region fallthrough
CT: control target
= control target key end

     0   :  { %7 = vsyncpa [#allocation3], 0  ;;  %s238_s0 = inlined_call_operand.hbm [shape: f32[2,256], index: 0, kind: input, shape index: {}]   ;;  %s239_s1 = inlined_call_operand.hbm [shape: f32[2,256], index: 1, kind: input, shape index: {}]   ;;  %s240_s2 = inlined_call_operand.vmem [shape: f32[2,1], index: 2, kind: output, shape index: {}]  }
   0x1   :  { %8 = vsyncpa [#allocation5], 0  ;;  %s184_s9 = smov [#allocation2]   ;;  %s185_s11 = smov [#allocation4]  }
   0x2   :  { %s15_s10 = sshll.u32 %s184_s9, 4  ;;  %s25_s12 = sshll.u32 %s185_s11, 4  ;;  %s16_s10 = int_to_ptr.vmem [resolvable:$true] %s15_s10  ;;  %s26_s12 = int_to_ptr.vmem [resolvable:$true] %s25_s12 }
   0x3   :  { %s136_s15 = scalar_lea.hbm %s238_s0, 64 }
   0x4   :  { %p137_p0 = scmp.ne.s32.totalorder %s238_s0, %s136_s15  ;;  %p140_p1 = scmp.lt.u32.totalorder %s136_s15, %s238_s0 }
   0x6   :  { %p142_p2 = pnand %p140_p1, %p137_p0 }
   0x8   :  { %145 = shalt.err (!%p142_p2)
}
   0x9   :  { %s146_s20 = scalar_lea.vmem %s16_s10, 64  ;;  %p151_p4 = scmp.lt.s32.totalorder %s16_s10, %s16_s10 }
   0xa   :  { %p147_p3 = scmp.ne.s32.totalorder %s16_s10, %s146_s20  ;;  %p152_p5 = scmp.lt.s32.totalorder %s146_s20, %s146_s20 }
   0xc   :  { %p153_p6 = por %p152_p5, %p151_p4 }
   0xe   :  { %p154_p7 = pnand %p153_p6, %p147_p3 }
  0x10   :  { %157 = shalt.err (!%p154_p7)
}
  0x11   :  { %18 = dma.hbm_to_vmem [thread:$0]  %s238_s0, 64, %s16_s10, [#allocation3]  }
  0x12   :  { %s158_s25 = scalar_lea.hbm %s239_s1, 64 }
  0x13   :  { %p159_p8 = scmp.ne.s32.totalorder %s239_s1, %s158_s25  ;;  %p162_p9 = scmp.lt.u32.totalorder %s158_s25, %s239_s1 }
  0x15   :  { %p164_p10 = pnand %p162_p9, %p159_p8 }
  0x17   :  { %167 = shalt.err (!%p164_p10)
}
  0x18   :  { %s168_s30 = scalar_lea.vmem %s26_s12, 64  ;;  %p173_p12 = scmp.lt.s32.totalorder %s26_s12, %s26_s12 }
  0x19   :  { %p169_p11 = scmp.ne.s32.totalorder %s26_s12, %s168_s30  ;;  %p174_p13 = scmp.lt.s32.totalorder %s168_s30, %s168_s30 }
  0x1b   :  { %p175_p0 = por %p174_p13, %p173_p12 }
  0x1d   :  { %p176_p1 = pnand %p175_p0, %p169_p11 }
  0x1f   :  { %179 = shalt.err (!%p176_p1)
}
  0x20   :  { %28 = dma.hbm_to_vmem [thread:$0]  %s239_s1, 64, %s26_s12, [#allocation5]  }
  0x21   :  { %180 = dma.done.wait [#allocation3], 64  }
  0x22   :  { %181 = vsyncadd [#allocation3], 4294967232 }
  0x23   :  { %182 = dma.done.wait [#allocation5], 64  }
  0x24   :  { %183 = vsyncadd [#allocation5], 4294967232  ;;  %v41_v0 = vlaneseq  ;;  %v186_v1 = vmov 1983009808   ;;  %v35_v6 = vld [vmem:[#allocation2] sm:$0xf] }
  0x25   :  { %v39_v2 = vunpack.c.l.s4 %v186_v1  ;;  %vm48_vm0 = vcmask 1041408   ;;  %v36_v12 = vld [vmem:[#allocation4] sm:$0xf]  ;;  %v187_v24 = vmov 269488144   ;;  %vm120_vm1 = vcmask 1024  }
  0x26   :  { %v42_v3 = vshrl.u32 %v41_v0, 7  ;;  %v101_v14 = vmul.f32 %v36_v12, %v35_v6  ;;  %v56_v25 = vunpack.c.l.s4 %v187_v24 }
  0x27   :  { %v40_v4 = vunpack.c.0.s8 %v39_v2 }
  0x28   :  { %v57_v26 = vunpack.c.0.s8 %v56_v25 }
  0x29   :  { %v43_v5 = vsub.s32 %v40_v4, %v42_v3 }
  0x2a   :  { %v60_v27 = vsub.s32 %v57_v26, %v42_v3 }
  0x2b   :  { %v44_v7 = vrot.slane %v35_v6, %v43_v5  ;;  %v92_v13 = vrot.slane %v36_v12, %v43_v5  ;;  %v109_v17 = vrot.slane %v101_v14, %v43_v5 }
  0x2d   :  { %v45_v8 = vcombine.high %v44_v7, %v44_v7  ;;  %v49_v9 = vsel %vm48_vm0, %v44_v7, -inf  ;;  %v93_v15 = vcombine.high %v92_v13, %v92_v13  ;;  %v96_v16 = vsel %vm48_vm0, %v92_v13, 0.0 }
  0x2e   :  { %v110_v19 = vcombine.high %v109_v17, %v109_v17  ;;  %v113_v20 = vsel %vm48_vm0, %v109_v17, 0.0 }
  0x2f   :  { %v50_v10 = vsel %vm48_vm0, %v45_v8, -inf  ;;  %v97_v18 = vsel %vm48_vm0, %v93_v15, 0.0 }
  0x30   :  { %v51_v11 = vmax.f32 %v49_v9, %v50_v10  ;;  %v98_v21 = vadd.f32 %v97_v18, %v96_v16  ;;  %v114_v22 = vsel %vm48_vm0, %v110_v19, 0.0 }
  0x31   :  { %v115_v23 = vadd.f32 %v114_v22, %v113_v20 }
  0x32   :  { %52 = vmax.xlane.f32.xlu0 %v51_v11  ;;  %99 = vadd.xlane.f32.xlu1 %v98_v21 }
  0x36   :  { %116 = vadd.xlane.f32.xlu1 %v115_v23 }
  0xbf   :  { %v53_v28 = vpop.xlane.xlu0 %52  ;;  %v100_v39 = vpop.xlane.xlu1 %99 }
  0xc0   :  { %v61_v29 = vrot.slane %v53_v28, %v60_v27 }
  0xc2   :  { %v63_v30 = vsub.f32 %v35_v6, %v61_v29 }
  0xc3   :  { %v117_v43 = vpop.xlane.xlu1 %116 }
  0xc4   :  { %v64_v31 = vmul.f32 1.442695, %v63_v30 }
  0xc6   :  { %132 = vpow2.f32 %v64_v31 }
  0xd0   :  { %v133_v32 = vpop.eup %132 }
  0xd1   :  { %v73_v33 = vrot.slane %v133_v32, %v43_v5 }
  0xd3   :  { %v74_v34 = vcombine.high %v73_v33, %v73_v33  ;;  %v77_v35 = vsel %vm48_vm0, %v73_v33, 0.0 }
  0xd5   :  { %v78_v36 = vsel %vm48_vm0, %v74_v34, 0.0 }
  0xd6   :  { %v79_v37 = vadd.f32 %v78_v36, %v77_v35 }
  0xd8   :  { %80 = vadd.xlane.f32.xlu0 %v79_v37 }
 0x165   :  { %v81_v38 = vpop.xlane.xlu0 %80 }
 0x166   :  { %134 = vlog2.f32 %v81_v38 }
 0x170   :  { %v135_v40 = vpop.eup %134 }
 0x171   :  { %v83_v41 = vmul.f32 0.6931472, %v135_v40 }
 0x173   :  { %v84_v42 = vadd.f32 %v83_v41, %v53_v28 }
 0x175   :  { %v118_v44 = vmul.f32 %v100_v39, %v84_v42 }
 0x177   :  { %v119_v45 = vsub.f32 %v118_v44, %v117_v43 }
 0x179   :  { %121 = vst.msk [vmem:[%s240_s2] sm:$0x3] %vm120_vm1, %v119_v45 }
 0x17a   :  { %126 = vsyncpa [#allocation3], 1 }
 0x17b   :  { %127 = vsyncpa [#allocation5], 1 }

</bundles_post_ra>
